<compile_context>
chip_gen: v5e
topology: v5e:2x2
jax: 0.10.0
libtpu: 0.0.40
codegen_flags: <defaults>
</compile_context>

<pallas_src>
import jax
import jax.numpy as jnp
from jax import lax
from jax.experimental import pallas as pl
from jax.experimental.pallas import tpu as pltpu

EPS = 1e-3


def _stats_kernel(x_ref, sum_ref, sumsq_ref):
    # x_ref:   VMEM (1, TC, THW)
    # sum_ref, sumsq_ref: VMEM (TC, 1) resident accumulators (same block
    # across the N / HW grid axes).
    @pl.when(jnp.logical_and(pl.program_id(1) == 0, pl.program_id(2) == 0))
    def _():
        sum_ref[...] = jnp.zeros_like(sum_ref)
        sumsq_ref[...] = jnp.zeros_like(sumsq_ref)

    x = x_ref[...].astype(jnp.float32)                     # (1, TC, THW)
    sum_ref[...] += jnp.sum(x, axis=(0, 2)).reshape(sum_ref.shape)
    sumsq_ref[...] += jnp.sum(x * x, axis=(0, 2)).reshape(sumsq_ref.shape)


def _apply_kernel(a_ref, b_ref, x_ref, o_ref):
    # a_ref/b_ref: VMEM (TC, 1) per-channel scale / shift (f32)
    # x_ref/o_ref: VMEM (1, TC, THW)
    x = x_ref[...].astype(jnp.float32)
    o_ref[...] = (a_ref[...] * x + b_ref[...]).astype(o_ref.dtype)


def _pick_tiles(C, HW):
    # Channel tile: must be a multiple of 8 or equal to C (8,128 rule).
    TC = C
    if C % 8 == 0:
        for cand in (32, 16, 8):
            if C % cand == 0:
                TC = cand
                break
    # Spatial tile: lane-dense (multiple of 128) when possible, else full HW.
    THW = HW
    if HW % 128 == 0:
        for cand in (2048, 1024, 512, 256, 128):
            if HW % cand == 0:
                THW = cand
                break
    return TC, THW


def adaptive_norm(x_nchw, w0, w1, gamma, beta):
    """x_nchw: (N, C, H, W).  Returns w0*x + w1*BatchNorm2d(x) (training mode)."""
    N, C, H, W = x_nchw.shape
    HW = H * W
    M = N * HW

    # Free view of NCHW — no transpose, no extra HBM traffic.
    x3 = x_nchw.reshape(N, C, HW)

    TC, THW = _pick_tiles(C, HW)
    c_tiles = C // TC
    s_tiles = HW // THW
    grid = (c_tiles, N, s_tiles)

    block_bytes = TC * THW * x3.dtype.itemsize
    vmem_bytes = int(min(48 * 2**20, max(4 * 2**20, 8 * block_bytes + 2 * 2**20)))

    # ---- pass 1: per-channel sum and sum-of-squares over (N, H*W) ----------
    sum_c, sumsq_c = pl.pallas_call(
        _stats_kernel,
        out_shape=(jax.ShapeDtypeStruct((C, 1), jnp.float32),
                   jax.ShapeDtypeStruct((C, 1), jnp.float32)),
        grid_spec=pltpu.PrefetchScalarGridSpec(
            num_scalar_prefetch=0,
            grid=grid,
            in_specs=[pl.BlockSpec((1, TC, THW), lambda c, n, s: (n, c, s))],
            out_specs=(pl.BlockSpec((TC, 1), lambda c, n, s: (c, 0)),
                       pl.BlockSpec((TC, 1), lambda c, n, s: (c, 0)))),
        compiler_params=pltpu.CompilerParams(
            dimension_semantics=("parallel", "arbitrary", "arbitrary"),
            vmem_limit_bytes=vmem_bytes),
    )(x3)

    # ---- tiny per-channel folding of BN + w0/w1 into scale/shift -----------
    inv_m = jnp.float32(1.0 / M)
    mean = sum_c * inv_m                                            # (C, 1)
    var = jnp.maximum(sumsq_c * inv_m - mean * mean, 0.0)           # biased var
    inv_std = lax.rsqrt(var + EPS)

    g = gamma.reshape(C, 1).astype(jnp.float32)
    bt = beta.reshape(C, 1).astype(jnp.float32)
    w0f = jnp.asarray(w0, jnp.float32)
    w1f = jnp.asarray(w1, jnp.float32)
    a = w0f + w1f * g * inv_std                                     # (C, 1)
    b = w1f * (bt - g * mean * inv_std)                             # (C, 1)

    # ---- pass 2: o = a_c * x + b_c -----------------------------------------
    out3 = pl.pallas_call(
        _apply_kernel,
        out_shape=jax.ShapeDtypeStruct((N, C, HW), x3.dtype),
        grid_spec=pltpu.PrefetchScalarGridSpec(
            num_scalar_prefetch=0,
            grid=grid,
            in_specs=[pl.BlockSpec((TC, 1), lambda c, n, s: (c, 0)),
                      pl.BlockSpec((TC, 1), lambda c, n, s: (c, 0)),
                      pl.BlockSpec((1, TC, THW), lambda c, n, s: (n, c, s))],
            out_specs=pl.BlockSpec((1, TC, THW), lambda c, n, s: (n, c, s))),
        compiler_params=pltpu.CompilerParams(
            dimension_semantics=("parallel", "parallel", "parallel"),
            vmem_limit_bytes=vmem_bytes),
    )(a, b, x3)

    return out3.reshape(N, C, H, W)


def _reference(x_nchw, w0, w1, gamma, beta):
    mean = jnp.mean(x_nchw, axis=(0, 2, 3), keepdims=True)
    var = jnp.mean((x_nchw - mean) ** 2, axis=(0, 2, 3), keepdims=True)
    x_hat = (x_nchw - mean) * lax.rsqrt(var + EPS)
    bn = x_hat * gamma.reshape(1, -1, 1, 1) + beta.reshape(1, -1, 1, 1)
    return w0 * x_nchw + w1 * bn


if __name__ == "__main__":
    key = jax.random.PRNGKey(0)
    kx, kg, kb = jax.random.split(key, 3)

    N, C, H, W = 2, 4, 16, 16
    x = jax.random.normal(kx, (N, C, H, W), dtype=jnp.float32)

    # Non-trivial (but deterministic) parameter values so the scale/shift
    # folding is actually exercised.  Module init would be w0=0, w1=1,
    # gamma=1, beta=0 — also supported.
    w0 = jnp.float32(0.3)
    w1 = jnp.float32(0.7)
    gamma = 1.0 + 0.1 * jax.random.normal(kg, (C,), dtype=jnp.float32)
    beta = 0.1 * jax.random.normal(kb, (C,), dtype=jnp.float32)

    fn = jax.jit(adaptive_norm)
    out = jax.block_until_ready(fn(x, w0, w1, gamma, beta))

    ref = _reference(x, w0, w1, gamma, beta)
    assert out.shape == (N, C, H, W)
    assert jnp.allclose(out, ref, atol=1e-4, rtol=1e-4), (
        float(jnp.max(jnp.abs(out - ref))))

    print("KERNEL_OK")
</pallas_src>

<mosaic_0001>
module attributes {stable_mosaic.version = 11 : i64} {
  func.func @_stats_kernel(%arg0: i32, %arg1: i32, %arg2: i32, %arg3: memref<1x4x256xf32, #tpu.memory_space<vmem>>, %arg4: memref<4x1xf32, #tpu.memory_space<vmem>>, %arg5: memref<4x1xf32, #tpu.memory_space<vmem>>) attributes {dimension_semantics = [#tpu.dimension_semantics<parallel>, #tpu.dimension_semantics<arbitrary>, #tpu.dimension_semantics<arbitrary>], iteration_bounds = array<i64: 1, 2, 1>, scalar_prefetch = 0 : i64, scratch_operands = 0 : i64, tpu.core_type = #tpu.core_type<tc>, window_params = [{transform_indices = @transform_0, window_bounds = array<i64: 1, 4, 256>}, {transform_indices = @transform_1, window_bounds = array<i64: 4, 1>}, {transform_indices = @transform_2, window_bounds = array<i64: 4, 1>}]} {
    %c0_i32 = arith.constant 0 : i32
    %0 = arith.cmpi eq, %arg1, %c0_i32 : i32
    %c0_i32_0 = arith.constant 0 : i32
    %1 = arith.cmpi eq, %arg2, %c0_i32_0 : i32
    %2 = arith.andi %0, %1 : i1
    %3 = arith.extui %2 : i1 to i32
    %c0_i32_1 = arith.constant 0 : i32
    %4 = arith.cmpi ne, %3, %c0_i32_1 : i32
    scf.if %4 {
      %cst_13 = arith.constant 0.000000e+00 : f32
      %17 = vector.broadcast %cst_13 : f32 to vector<4x1xf32>
      %c0_14 = arith.constant 0 : index
      %c0_15 = arith.constant 0 : index
      %18 = vector.load %arg4[%c0_14, %c0_15] : memref<4x1xf32, #tpu.memory_space<vmem>>, vector<4x1xf32>
      tpu.vector_store %arg4[%c0_14, %c0_15], %17 {strides = array<i32>} : memref<4x1xf32, #tpu.memory_space<vmem>>, vector<4x1xf32>,
      %cst_16 = arith.constant 0.000000e+00 : f32
      %19 = vector.broadcast %cst_16 : f32 to vector<4x1xf32>
      %c0_17 = arith.constant 0 : index
      %c0_18 = arith.constant 0 : index
      %20 = vector.load %arg5[%c0_17, %c0_18] : memref<4x1xf32, #tpu.memory_space<vmem>>, vector<4x1xf32>
      tpu.vector_store %arg5[%c0_17, %c0_18], %19 {strides = array<i32>} : memref<4x1xf32, #tpu.memory_space<vmem>>, vector<4x1xf32>,
    } else {
    }
    %c0 = arith.constant 0 : index
    %c0_2 = arith.constant 0 : index
    %c0_3 = arith.constant 0 : index
    %5 = vector.load %arg3[%c0, %c0_2, %c0_3] : memref<1x4x256xf32, #tpu.memory_space<vmem>>, vector<1x4x256xf32>
    %c0_4 = arith.constant 0 : index
    %c0_5 = arith.constant 0 : index
    %6 = vector.load %arg4[%c0_4, %c0_5] : memref<4x1xf32, #tpu.memory_space<vmem>>, vector<4x1xf32>
    %cst = arith.constant dense<0.000000e+00> : vector<4xf32>
    %7 = vector.multi_reduction <add>, %5, %cst [0, 2] : vector<1x4x256xf32> to vector<4xf32>
    %8 = vector.shape_cast %7 : vector<4xf32> to vector<4x1xf32>
    %9 = arith.addf %6, %8 : vector<4x1xf32>
    %c0_6 = arith.constant 0 : index
    %c0_7 = arith.constant 0 : index
    %10 = vector.load %arg4[%c0_6, %c0_7] : memref<4x1xf32, #tpu.memory_space<vmem>>, vector<4x1xf32>
    tpu.vector_store %arg4[%c0_6, %c0_7], %9 {strides = array<i32>} : memref<4x1xf32, #tpu.memory_space<vmem>>, vector<4x1xf32>,
    %c0_8 = arith.constant 0 : index
    %c0_9 = arith.constant 0 : index
    %11 = vector.load %arg5[%c0_8, %c0_9] : memref<4x1xf32, #tpu.memory_space<vmem>>, vector<4x1xf32>
    %12 = arith.mulf %5, %5 : vector<1x4x256xf32>
    %cst_10 = arith.constant dense<0.000000e+00> : vector<4xf32>
    %13 = vector.multi_reduction <add>, %12, %cst_10 [0, 2] : vector<1x4x256xf32> to vector<4xf32>
    %14 = vector.shape_cast %13 : vector<4xf32> to vector<4x1xf32>
    %15 = arith.addf %11, %14 : vector<4x1xf32>
    %c0_11 = arith.constant 0 : index
    %c0_12 = arith.constant 0 : index
    %16 = vector.load %arg5[%c0_11, %c0_12] : memref<4x1xf32, #tpu.memory_space<vmem>>, vector<4x1xf32>
    tpu.vector_store %arg5[%c0_11, %c0_12], %15 {strides = array<i32>} : memref<4x1xf32, #tpu.memory_space<vmem>>, vector<4x1xf32>,
    return
  }
  func.func @transform_0(%arg0: i32, %arg1: i32, %arg2: i32) -> (i32, i32, i32) {
    %c0_i32 = arith.constant 0 : i32
    return %arg1, %arg0, %arg2 : i32, i32, i32
  }
  func.func @transform_1(%arg0: i32, %arg1: i32, %arg2: i32) -> (i32, i32) {
    %c0_i32 = arith.constant 0 : i32
    %c0_i32_0 = arith.constant 0 : i32
    return %arg0, %c0_i32 : i32, i32
  }
  func.func @transform_2(%arg0: i32, %arg1: i32, %arg2: i32) -> (i32, i32) {
    %c0_i32 = arith.constant 0 : i32
    %c0_i32_0 = arith.constant 0 : i32
    return %arg0, %c0_i32 : i32, i32
  }
}

module attributes {stable_mosaic.version = 11 : i64} {
  func.func @_apply_kernel(%arg0: i32, %arg1: i32, %arg2: i32, %arg3: memref<4x1xf32, #tpu.memory_space<vmem>>, %arg4: memref<4x1xf32, #tpu.memory_space<vmem>>, %arg5: memref<1x4x256xf32, #tpu.memory_space<vmem>>, %arg6: memref<1x4x256xf32, #tpu.memory_space<vmem>>) attributes {dimension_semantics = [#tpu.dimension_semantics<parallel>, #tpu.dimension_semantics<parallel>, #tpu.dimension_semantics<parallel>], iteration_bounds = array<i64: 1, 2, 1>, scalar_prefetch = 0 : i64, scratch_operands = 0 : i64, tpu.core_type = #tpu.core_type<tc>, window_params = [{transform_indices = @transform_0, window_bounds = array<i64: 4, 1>}, {transform_indices = @transform_1, window_bounds = array<i64: 4, 1>}, {transform_indices = @transform_2, window_bounds = array<i64: 1, 4, 256>}, {transform_indices = @transform_3, window_bounds = array<i64: 1, 4, 256>}]} {
    %c0 = arith.constant 0 : index
    %c0_0 = arith.constant 0 : index
    %c0_1 = arith.constant 0 : index
    %0 = vector.load %arg5[%c0, %c0_0, %c0_1] : memref<1x4x256xf32, #tpu.memory_space<vmem>>, vector<1x4x256xf32>
    %c0_2 = arith.constant 0 : index
    %c0_3 = arith.constant 0 : index
    %1 = vector.load %arg3[%c0_2, %c0_3] : memref<4x1xf32, #tpu.memory_space<vmem>>, vector<4x1xf32>
    %2 = vector.shape_cast %1 : vector<4x1xf32> to vector<1x4x1xf32>
    %3 = vector.broadcast %2 : vector<1x4x1xf32> to vector<1x4x256xf32>
    %4 = arith.mulf %3, %0 : vector<1x4x256xf32>
    %c0_4 = arith.constant 0 : index
    %c0_5 = arith.constant 0 : index
    %5 = vector.load %arg4[%c0_4, %c0_5] : memref<4x1xf32, #tpu.memory_space<vmem>>, vector<4x1xf32>
    %6 = vector.shape_cast %5 : vector<4x1xf32> to vector<1x4x1xf32>
    %7 = vector.broadcast %6 : vector<1x4x1xf32> to vector<1x4x256xf32>
    %8 = arith.addf %4, %7 : vector<1x4x256xf32>
    %c0_6 = arith.constant 0 : index
    %c0_7 = arith.constant 0 : index
    %c0_8 = arith.constant 0 : index
    %9 = vector.load %arg6[%c0_6, %c0_7, %c0_8] : memref<1x4x256xf32, #tpu.memory_space<vmem>>, vector<1x4x256xf32>
    tpu.vector_store %arg6[%c0_6, %c0_7, %c0_8], %8 {strides = array<i32>} : memref<1x4x256xf32, #tpu.memory_space<vmem>>, vector<1x4x256xf32>,
    return
  }
  func.func @transform_0(%arg0: i32, %arg1: i32, %arg2: i32) -> (i32, i32) {
    %c0_i32 = arith.constant 0 : i32
    %c0_i32_0 = arith.constant 0 : i32
    return %arg0, %c0_i32 : i32, i32
  }
  func.func @transform_1(%arg0: i32, %arg1: i32, %arg2: i32) -> (i32, i32) {
    %c0_i32 = arith.constant 0 : i32
    %c0_i32_0 = arith.constant 0 : i32
    return %arg0, %c0_i32 : i32, i32
  }
  func.func @transform_2(%arg0: i32, %arg1: i32, %arg2: i32) -> (i32, i32, i32) {
    %c0_i32 = arith.constant 0 : i32
    return %arg1, %arg0, %arg2 : i32, i32, i32
  }
  func.func @transform_3(%arg0: i32, %arg1: i32, %arg2: i32) -> (i32, i32, i32) {
    %c0_i32 = arith.constant 0 : i32
    return %arg1, %arg0, %arg2 : i32, i32, i32
  }
}

</mosaic_0001>

<bundles_post_ra>
// kernel: adaptive_norm.3
= control target key start
LH: loop header
LB: loop body
LE: loop exit
PB: predicated region body
PF: predicated region fallthrough
CT: control target
= control target key end

     0   :  { %s533_s12 = smov 0   ;;  %s535_s13 = smov 0   ;;  %s572_s0 = inlined_call_operand.vmem [shape: f32[4,1], index: 0, kind: input, shape index: {}]   ;;  %s573_s1 = inlined_call_operand.vmem [shape: f32[4,1], index: 1, kind: input, shape index: {}]   ;;  %s574_s2 = inlined_call_operand.vmem [shape: f32[2,4,256], index: 2, kind: input, shape index: {}]   ;;  %s575_s3 = inlined_call_operand.vmem [shape: f32[2,4,256], index: 3, kind: output, shape index: {}]  }
   0x1   :  { %s537_s14 = smov 0  }
   0x2 LB: > { %s28_s15 = sadd.s32 1, %s506_s13  ;;  %p453_p0 = scmp.ge.s32.totalorder %s510_s14, 1  ;;  %s510_s14 = sphi %s537_s14, %s13_s14   ;;  %s506_s13 = sphi %s535_s13, %s577_s13   ;;  %s502_s12 = sphi %s533_s12, %s576_s12  }
   0x3   : > { %p30_p1 = scmp.ge.s32.totalorder %s28_s15, 2  ;;  %p191_p2 = scmp.lt.s32.totalorder %s510_s14, 3 }
   0x5   : > { %s579_s15 = smov (%p30_p1, %s28_s15), 0  ;;  %p192_p3 = pnand %p453_p0, %p191_p2 }
   0x6   : > { %p248_p4 = scmp.lt.s32.totalorder (!%p192_p3), %s502_s12, 1 }
   0x7   : > { %195 = sbr.rel (%p192_p3) target bundleno = 143 (0x8f), region = 32 }
   0xc   : > { %v276_v0 = vld [vmem:[%s572_s0] sm:$0xf]  ;;  %v512_v1 = vmov 0   ;;  %s581_s12 = smov (!%p248_p4, %s502_s12), 1  ;;  %vm301_vm0 = vcmask 1043456  }
   0xd   : > { %487 = vset.pattern.permute.xlu0 %v512_v1  ;;  %v290_v2 = vld [vmem:[%s573_s1] sm:$0xf]  ;;  %s460_s20 = sshll.u32 %s581_s12, 3 }
   0xe   : > { %279 = vperm.xlu0 %487, %v276_v0   ;;  %s259_s23 = scalar_lea.vmem %s574_s2, %s460_s20  ;;  %s273_s26 = scalar_lea.vmem %s575_s3, %s460_s20 }
   0xf   : > { %v275_v3 = vld [vmem:[%s259_s23] sm:$0xff] }
  0x10   : > { %283 = vst [vmem:[#allocation1] ss:$2 sm:$0xff] %v275_v3 }
  0x16   : > { %293 = vperm.xlu0 %487, %v290_v2  }
  0x17   : > { %v285_v5 = vld.sshfl [vmem:[#allocation1 + $0x8] sm:$0xff pattern:$0x75316420]  ;;  %v284_v6 = vld.sshfl [vmem:[#allocation1] sm:$0xff pattern:$0x75316420] }
  0x80   : > { %v280_v4 = vpop.permute.xlu0 %279 }
  0x81   : > { %v289_v7 = vmul.f32 %v285_v5, %v280_v4  ;;  %v288_v9 = vmul.f32 %v284_v6, %v280_v4 }
  0x88   : > { %v294_v8 = vpop.permute.xlu0 %293 }
  0x89   : > { %v297_v10 = vadd.f32 %v294_v8, %v289_v7  ;;  %v296_v11 = vadd.f32 %v294_v8, %v288_v9 }
  0x8b   : > { %v300_v12 = vrot.slane %v297_v10, 4 }
  0x8d   : > { %v302_v13 = vsel %vm301_vm0, %v296_v11, %v300_v12 }
  0x8e   : > { %304 = vst [vmem:[%s273_s26] sm:$0xff] %v302_v13 }
  0x8f PF: > { %s13_s14 = sadd.s32 1, %s510_s14   ;;  %s576_s12 = smov %s506_s13 }
  0x90   : > { %p10_p5 = scmp.ge.s32.totalorder %s13_s14, 4   ;;  %s577_s13 = smov %s579_s15 }
  0x92   :  { %12 = sbr.rel (!%p10_p5) target bundleno = 2 (0x2), region = 68 }

// kernel: adaptive_norm.2
= control target key start
LH: loop header
LB: loop body
LE: loop exit
PB: predicated region body
PF: predicated region fallthrough
CT: control target
= control target key end

     0   :  { %s423_s9 = smov 0   ;;  %s425_s10 = smov 0   ;;  %s471_s0 = inlined_call_operand.vmem [shape: f32[2,4,256], index: 0, kind: input, shape index: {}]   ;;  %s472_s1 = inlined_call_operand.vmem [shape: f32[4,1], index: 1, kind: output, shape index: {0}]   ;;  %s473_s2 = inlined_call_operand.vmem [shape: f32[4,1], index: 2, kind: output, shape index: {1}]  }
   0x1   :  { %s427_s11 = smov 0  }
   0x2 LB: > { %s28_s12 = sadd.s32 1, %s401_s10  ;;  %p348_p0 = scmp.ge.s32.totalorder %s405_s11, 1  ;;  %s405_s11 = sphi %s427_s11, %s13_s11   ;;  %s401_s10 = sphi %s425_s10, %s475_s10   ;;  %s397_s9 = sphi %s423_s9, %s474_s9  }
   0x3   : > { %p30_p1 = scmp.ge.s32.totalorder %s28_s12, 2  ;;  %p147_p2 = scmp.lt.s32.totalorder %s405_s11, 3 }
   0x5   : > { %s477_s12 = smov (%p30_p1, %s28_s12), 0  ;;  %p148_p3 = pnand %p348_p0, %p147_p2 }
   0x6   : > { %p181_p4 = scmp.lt.s32.totalorder (!%p148_p3), %s397_s9, 1  ;;  %p202_p5 = scmp.eq.s32.totalorder (!%p148_p3), %s397_s9, 0 }
   0x7   : > { %151 = sbr.rel (%p148_p3) target bundleno = 156 (0x9c), region = 24 }
   0xc   : > { %s479_s9 = smov (!%p181_p4, %s397_s9), 1  ;;  %207 = sbr.rel (!%p202_p5) target bundleno = 17 (0x11), region = 28  ;;  %vm208_vm0 = vcmask (%p202_p5), 3072   ;;  %v407_v0 = vmov (%p202_p5), 0.0  }
   0xd   : > { %s356_s13 = sshll.u32 %s479_s9, 3  ;;  %209 = vst.msk [vmem:[%s472_s1] sm:$0xf] (%p202_p5), %vm208_vm0, %v407_v0 }
   0xe   : > { %s192_s16 = scalar_lea.vmem %s471_s0, %s356_s13  ;;  %210 = vst.msk [vmem:[%s473_s2] sm:$0xf] (%p202_p5), %vm208_vm0, %v407_v0 }
  0x11 PF: > { %v211_v1 = vld [vmem:[%s192_s16] sm:$0xff]  ;;  %vm219_vm1 = vcmask 1043456   ;;  %vm226_vm2 = vcmask 3072  }
  0x12   : > { %214 = vst [vmem:[#allocation1] ss:$2 sm:$0xff] %v211_v1  ;;  %v229_v2 = vmul.f32 %v211_v1, %v211_v1 }
  0x14   : > { %v212_v13 = vld [vmem:[%s472_s1] sm:$0xf] }
  0x15   : > { %v228_v16 = vld [vmem:[%s473_s2] sm:$0xf] }
  0x19   : > { %v215_v3 = vld.sshfl [vmem:[#allocation1] sm:$0xff pattern:$0x75316420]  ;;  %v216_v4 = vld.sshfl [vmem:[#allocation1 + $0x8] sm:$0xff pattern:$0x75316420] }
  0x1a   : > { %v220_v5 = vsel %vm219_vm1, %v215_v3, 0.0  ;;  %v221_v6 = vsel %vm219_vm1, %v216_v4, 0.0  ;;  %231 = vst [vmem:[#allocation1] ss:$2 sm:$0xff] %v229_v2 }
  0x1b   : > { %v222_v7 = vadd.f32 %v221_v6, %v220_v5 }
  0x1d   : > { %223 = vadd.xlane.f32.xlu0 %v222_v7 }
  0x21   : > { %v232_v8 = vld.sshfl [vmem:[#allocation1] sm:$0xff pattern:$0x75316420]  ;;  %v233_v9 = vld.sshfl [vmem:[#allocation1 + $0x8] sm:$0xff pattern:$0x75316420] }
  0x22   : > { %v236_v10 = vsel %vm219_vm1, %v232_v8, 0.0  ;;  %v237_v11 = vsel %vm219_vm1, %v233_v9, 0.0 }
  0x23   : > { %v238_v12 = vadd.f32 %v237_v11, %v236_v10 }
  0x25   : > { %239 = vadd.xlane.f32.xlu0 %v238_v12 }
  0x90   : > { %v224_v14 = vpop.xlane.xlu0 %223 }
  0x91   : > { %v225_v15 = vadd.f32 %v224_v14, %v212_v13 }
  0x93   : > { %227 = vst.msk [vmem:[%s472_s1] sm:$0xf] %vm226_vm2, %v225_v15 }
  0x98   : > { %v240_v17 = vpop.xlane.xlu0 %239 }
  0x99   : > { %v241_v18 = vadd.f32 %v240_v17, %v228_v16 }
  0x9b   : > { %242 = vst.msk [vmem:[%s473_s2] sm:$0xf] %vm226_vm2, %v241_v18 }
  0x9c PF: > { %s13_s11 = sadd.s32 1, %s405_s11   ;;  %s474_s9 = smov %s401_s10 }
  0x9d   : > { %p10_p6 = scmp.ge.s32.totalorder %s13_s11, 4   ;;  %s475_s10 = smov %s477_s12 }
  0x9f   :  { %12 = sbr.rel (!%p10_p6) target bundleno = 2 (0x2), region = 70 }

</bundles_post_ra>
